<compile_context>
chip_gen: v7x
topology: tpu7x:2x2x1
jax: 0.10.0
libtpu: 0.0.40
codegen_flags: <defaults>
</compile_context>

<pallas_src>
import functools

import jax
import jax.numpy as jnp
from jax import lax
from jax.experimental import pallas as pl
from jax.experimental.pallas import tpu as pltpu


def rnn_kernel(x_ref, wih_ref, whh_ref, b_ref, wfc_ref, bfc_ref, h0_ref,
               out_ref, pre_ref, *, seq_len, batch):
    """Whole RNN forward in one invocation (no time grid).

    x_ref  : (S*B, I)  embedded inputs, time-major rows (row t*B+b = x[t, b])
    wih_ref: (I, H)    W_ih^T
    whh_ref: (H, H)    W_hh^T
    b_ref  : (1, H)    b_ih + b_hh
    wfc_ref: (H, O)    W_fc^T
    bfc_ref: (1, O)    b_fc
    h0_ref : (B, H)    initial hidden state
    out_ref: (B, O)    logits for the last hidden state
    pre_ref: (S*B, H)  VMEM scratch holding the hoisted input projection
    """
    # Hoisted input projection: one big matmul, bias folded in exactly once.
    pre_ref[...] = (
        jnp.dot(x_ref[...], wih_ref[...], preferred_element_type=jnp.float32)
        + b_ref[...])

    w_hh = whh_ref[...]  # keep resident in vregs across the loop

    def step(t, h):
        start = pl.multiple_of(t * batch, batch)
        pre_t = pre_ref[pl.ds(start, batch), :]          # (B, H)
        return jnp.tanh(
            pre_t + jnp.dot(h, w_hh, preferred_element_type=jnp.float32))

    h_last = lax.fori_loop(0, seq_len, step, h0_ref[...], unroll=True)

    out_ref[...] = (
        jnp.dot(h_last, wfc_ref[...], preferred_element_type=jnp.float32)
        + bfc_ref[...]).astype(out_ref.dtype)


def my_rnn_forward(tokens, params, h0):
    """tokens: (B, S) int32 -> logits (B, output_len) float32."""
    emb = params["embedding"]           # (words_num, input_len)
    w_ih_t = params["w_ih_t"]           # (input_len, hidden_len)
    w_hh_t = params["w_hh_t"]           # (hidden_len, hidden_len)
    b_rnn = params["b_rnn"]             # (1, hidden_len)  == b_ih + b_hh
    w_fc_t = params["w_fc_t"]           # (hidden_len, output_len)
    b_fc = params["b_fc"]               # (1, output_len)

    B, S = tokens.shape
    I = emb.shape[1]
    H = w_hh_t.shape[0]
    O = w_fc_t.shape[1]

    # Embedding lookup + dropout(identity) — glue in plain JAX; flatten to
    # time-major rows so the kernel's hoisted projection is a single matmul.
    x_emb = jnp.take(emb, tokens, axis=0)          # (B, S, I)
    x_seq = jnp.transpose(x_emb, (1, 0, 2))        # (S, B, I)
    x_flat = x_seq.reshape(S * B, I)               # (S*B, I)

    kernel = functools.partial(rnn_kernel, seq_len=S, batch=B)

    out = pl.pallas_call(
        kernel,
        out_shape=jax.ShapeDtypeStruct((B, O), jnp.float32),
        # No grid: single invocation; all operands live whole in VMEM.
        scratch_shapes=[pltpu.VMEM((S * B, H), jnp.float32)],
    )(x_flat, w_ih_t, w_hh_t, b_rnn, w_fc_t, b_fc, h0)
    return out


def make_params(key, words_num, input_len, hidden_len, output_len):
    ks = jax.random.split(key, 7)
    scale_rnn = 1.0 / jnp.sqrt(hidden_len)
    scale_fc = 1.0 / jnp.sqrt(hidden_len)
    params = {
        "embedding": jax.random.normal(ks[0], (words_num, input_len),
                                       jnp.float32),
        # store transposed weights so the kernel does x @ W^T as plain matmul
        "w_ih_t": jax.random.uniform(ks[1], (input_len, hidden_len),
                                     jnp.float32, -scale_rnn, scale_rnn),
        "w_hh_t": jax.random.uniform(ks[2], (hidden_len, hidden_len),
                                     jnp.float32, -scale_rnn, scale_rnn),
        "b_rnn": (jax.random.uniform(ks[3], (1, hidden_len), jnp.float32,
                                     -scale_rnn, scale_rnn)
                  + jax.random.uniform(ks[4], (1, hidden_len), jnp.float32,
                                       -scale_rnn, scale_rnn)),
        "w_fc_t": jax.random.uniform(ks[5], (hidden_len, output_len),
                                     jnp.float32, -scale_fc, scale_fc),
        "b_fc": jax.random.uniform(ks[6], (1, output_len), jnp.float32,
                                   -scale_fc, scale_fc),
    }
    return params


def reference_forward(tokens, params, h0):
    """Pure-JAX reference of the same forward pass (sanity check)."""
    x = jnp.take(params["embedding"], tokens, axis=0)   # (B, S, I)
    h = h0
    for t in range(x.shape[1]):
        h = jnp.tanh(x[:, t, :] @ params["w_ih_t"]
                     + h @ params["w_hh_t"] + params["b_rnn"])
    return h @ params["w_fc_t"] + params["b_fc"]


if __name__ == "__main__":
    # small shapes consistent with the module
    batch, seq = 4, 8
    words_num, input_len, hidden_len, output_len = 50, 16, 32, 8

    key = jax.random.PRNGKey(0)
    k_param, k_tok, k_h0 = jax.random.split(key, 3)

    params = make_params(k_param, words_num, input_len, hidden_len, output_len)
    tokens = jax.random.randint(k_tok, (batch, seq), 0, words_num, jnp.int32)
    # forward() draws h0 = randn(layer_num, B, H); here layer_num=1, squeezed,
    # generated deterministically from the PRNG key.
    h0 = jax.random.normal(k_h0, (batch, hidden_len), jnp.float32)

    out = my_rnn_forward(tokens, params, h0)
    out = jax.block_until_ready(out)

    ref = reference_forward(tokens, params, h0)
    assert out.shape == (batch, output_len)
    assert jnp.allclose(out, ref, atol=1e-4, rtol=1e-4)

    print("KERNEL_OK")
</pallas_src>

<mosaic_0001>
module attributes {stable_mosaic.version = 11 : i64} {
  func.func @rnn_kernel(%arg0: memref<32x16xf32, #tpu.memory_space<vmem>>, %arg1: memref<16x32xf32, #tpu.memory_space<vmem>>, %arg2: memref<32x32xf32, #tpu.memory_space<vmem>>, %arg3: memref<1x32xf32, #tpu.memory_space<vmem>>, %arg4: memref<32x8xf32, #tpu.memory_space<vmem>>, %arg5: memref<1x8xf32, #tpu.memory_space<vmem>>, %arg6: memref<4x32xf32, #tpu.memory_space<vmem>>, %arg7: memref<4x8xf32, #tpu.memory_space<vmem>>, %arg8: memref<32x32xf32, #tpu.memory_space<vmem>>) attributes {dimension_semantics = [], scalar_prefetch = 0 : i64, scratch_operands = 1 : i64, tpu.core_type = #tpu.core_type<tc>} {
    %c0 = arith.constant 0 : index
    %c0_0 = arith.constant 0 : index
    %0 = vector.load %arg0[%c0, %c0_0] : memref<32x16xf32, #tpu.memory_space<vmem>>, vector<32x16xf32>
    %c0_1 = arith.constant 0 : index
    %c0_2 = arith.constant 0 : index
    %1 = vector.load %arg1[%c0_1, %c0_2] : memref<16x32xf32, #tpu.memory_space<vmem>>, vector<16x32xf32>
    %cst = arith.constant dense<0.000000e+00> : vector<32x32xf32>
    %2 = tpu.matmul %0, %1, %cst {dimension_numbers = #tpu.dot_dimension_numbers<[1], [0], [0], [1], [0, 0, 1, 1], [], []>} : vector<32x16xf32>, vector<16x32xf32>, vector<32x32xf32> -> vector<32x32xf32>
    %c0_3 = arith.constant 0 : index
    %c0_4 = arith.constant 0 : index
    %3 = vector.load %arg3[%c0_3, %c0_4] : memref<1x32xf32, #tpu.memory_space<vmem>>, vector<1x32xf32>
    %4 = vector.broadcast %3 : vector<1x32xf32> to vector<32x32xf32>
    %5 = arith.addf %2, %4 : vector<32x32xf32>
    %c0_5 = arith.constant 0 : index
    %c0_6 = arith.constant 0 : index
    %6 = vector.load %arg8[%c0_5, %c0_6] : memref<32x32xf32, #tpu.memory_space<vmem>>, vector<32x32xf32>
    tpu.vector_store %arg8[%c0_5, %c0_6], %5 {strides = array<i32>} : memref<32x32xf32, #tpu.memory_space<vmem>>, vector<32x32xf32>,
    %c0_7 = arith.constant 0 : index
    %c0_8 = arith.constant 0 : index
    %7 = vector.load %arg2[%c0_7, %c0_8] : memref<32x32xf32, #tpu.memory_space<vmem>>, vector<32x32xf32>
    %c0_9 = arith.constant 0 : index
    %c0_10 = arith.constant 0 : index
    %8 = vector.load %arg6[%c0_9, %c0_10] : memref<4x32xf32, #tpu.memory_space<vmem>>, vector<4x32xf32>
    %c0_i32 = arith.constant 0 : i32
    %c4_i32 = arith.constant 4 : i32
    %9 = arith.muli %c0_i32, %c4_i32 : i32
    %10 = tpu.assume_multiple %9, 4 : i32
    %11 = arith.index_cast %10 : i32 to index
    %c0_11 = arith.constant 0 : index
    %12 = vector.load %arg8[%11, %c0_11] : memref<32x32xf32, #tpu.memory_space<vmem>>, vector<4x32xf32>
    %cst_12 = arith.constant dense<0.000000e+00> : vector<4x32xf32>
    %13 = tpu.matmul %8, %7, %cst_12 {dimension_numbers = #tpu.dot_dimension_numbers<[1], [0], [0], [1], [0, 0, 1, 1], [], []>} : vector<4x32xf32>, vector<32x32xf32>, vector<4x32xf32> -> vector<4x32xf32>
    %14 = arith.addf %12, %13 : vector<4x32xf32>
    %15 = math.tanh %14 : vector<4x32xf32>
    %c1_i32 = arith.constant 1 : i32
    %c4_i32_13 = arith.constant 4 : i32
    %16 = arith.muli %c1_i32, %c4_i32_13 : i32
    %17 = tpu.assume_multiple %16, 4 : i32
    %18 = arith.index_cast %17 : i32 to index
    %c0_14 = arith.constant 0 : index
    %19 = vector.load %arg8[%18, %c0_14] : memref<32x32xf32, #tpu.memory_space<vmem>>, vector<4x32xf32>
    %cst_15 = arith.constant dense<0.000000e+00> : vector<4x32xf32>
    %20 = tpu.matmul %15, %7, %cst_15 {dimension_numbers = #tpu.dot_dimension_numbers<[1], [0], [0], [1], [0, 0, 1, 1], [], []>} : vector<4x32xf32>, vector<32x32xf32>, vector<4x32xf32> -> vector<4x32xf32>
    %21 = arith.addf %19, %20 : vector<4x32xf32>
    %22 = math.tanh %21 : vector<4x32xf32>
    %c2_i32 = arith.constant 2 : i32
    %c4_i32_16 = arith.constant 4 : i32
    %23 = arith.muli %c2_i32, %c4_i32_16 : i32
    %24 = tpu.assume_multiple %23, 4 : i32
    %25 = arith.index_cast %24 : i32 to index
    %c0_17 = arith.constant 0 : index
    %26 = vector.load %arg8[%25, %c0_17] : memref<32x32xf32, #tpu.memory_space<vmem>>, vector<4x32xf32>
    %cst_18 = arith.constant dense<0.000000e+00> : vector<4x32xf32>
    %27 = tpu.matmul %22, %7, %cst_18 {dimension_numbers = #tpu.dot_dimension_numbers<[1], [0], [0], [1], [0, 0, 1, 1], [], []>} : vector<4x32xf32>, vector<32x32xf32>, vector<4x32xf32> -> vector<4x32xf32>
    %28 = arith.addf %26, %27 : vector<4x32xf32>
    %29 = math.tanh %28 : vector<4x32xf32>
    %c3_i32 = arith.constant 3 : i32
    %c4_i32_19 = arith.constant 4 : i32
    %30 = arith.muli %c3_i32, %c4_i32_19 : i32
    %31 = tpu.assume_multiple %30, 4 : i32
    %32 = arith.index_cast %31 : i32 to index
    %c0_20 = arith.constant 0 : index
    %33 = vector.load %arg8[%32, %c0_20] : memref<32x32xf32, #tpu.memory_space<vmem>>, vector<4x32xf32>
    %cst_21 = arith.constant dense<0.000000e+00> : vector<4x32xf32>
    %34 = tpu.matmul %29, %7, %cst_21 {dimension_numbers = #tpu.dot_dimension_numbers<[1], [0], [0], [1], [0, 0, 1, 1], [], []>} : vector<4x32xf32>, vector<32x32xf32>, vector<4x32xf32> -> vector<4x32xf32>
    %35 = arith.addf %33, %34 : vector<4x32xf32>
    %36 = math.tanh %35 : vector<4x32xf32>
    %c4_i32_22 = arith.constant 4 : i32
    %c4_i32_23 = arith.constant 4 : i32
    %37 = arith.muli %c4_i32_22, %c4_i32_23 : i32
    %38 = tpu.assume_multiple %37, 4 : i32
    %39 = arith.index_cast %38 : i32 to index
    %c0_24 = arith.constant 0 : index
    %40 = vector.load %arg8[%39, %c0_24] : memref<32x32xf32, #tpu.memory_space<vmem>>, vector<4x32xf32>
    %cst_25 = arith.constant dense<0.000000e+00> : vector<4x32xf32>
    %41 = tpu.matmul %36, %7, %cst_25 {dimension_numbers = #tpu.dot_dimension_numbers<[1], [0], [0], [1], [0, 0, 1, 1], [], []>} : vector<4x32xf32>, vector<32x32xf32>, vector<4x32xf32> -> vector<4x32xf32>
    %42 = arith.addf %40, %41 : vector<4x32xf32>
    %43 = math.tanh %42 : vector<4x32xf32>
    %c5_i32 = arith.constant 5 : i32
    %c4_i32_26 = arith.constant 4 : i32
    %44 = arith.muli %c5_i32, %c4_i32_26 : i32
    %45 = tpu.assume_multiple %44, 4 : i32
    %46 = arith.index_cast %45 : i32 to index
    %c0_27 = arith.constant 0 : index
    %47 = vector.load %arg8[%46, %c0_27] : memref<32x32xf32, #tpu.memory_space<vmem>>, vector<4x32xf32>
    %cst_28 = arith.constant dense<0.000000e+00> : vector<4x32xf32>
    %48 = tpu.matmul %43, %7, %cst_28 {dimension_numbers = #tpu.dot_dimension_numbers<[1], [0], [0], [1], [0, 0, 1, 1], [], []>} : vector<4x32xf32>, vector<32x32xf32>, vector<4x32xf32> -> vector<4x32xf32>
    %49 = arith.addf %47, %48 : vector<4x32xf32>
    %50 = math.tanh %49 : vector<4x32xf32>
    %c6_i32 = arith.constant 6 : i32
    %c4_i32_29 = arith.constant 4 : i32
    %51 = arith.muli %c6_i32, %c4_i32_29 : i32
    %52 = tpu.assume_multiple %51, 4 : i32
    %53 = arith.index_cast %52 : i32 to index
    %c0_30 = arith.constant 0 : index
    %54 = vector.load %arg8[%53, %c0_30] : memref<32x32xf32, #tpu.memory_space<vmem>>, vector<4x32xf32>
    %cst_31 = arith.constant dense<0.000000e+00> : vector<4x32xf32>
    %55 = tpu.matmul %50, %7, %cst_31 {dimension_numbers = #tpu.dot_dimension_numbers<[1], [0], [0], [1], [0, 0, 1, 1], [], []>} : vector<4x32xf32>, vector<32x32xf32>, vector<4x32xf32> -> vector<4x32xf32>
    %56 = arith.addf %54, %55 : vector<4x32xf32>
    %57 = math.tanh %56 : vector<4x32xf32>
    %c7_i32 = arith.constant 7 : i32
    %c4_i32_32 = arith.constant 4 : i32
    %58 = arith.muli %c7_i32, %c4_i32_32 : i32
    %59 = tpu.assume_multiple %58, 4 : i32
    %60 = arith.index_cast %59 : i32 to index
    %c0_33 = arith.constant 0 : index
    %61 = vector.load %arg8[%60, %c0_33] : memref<32x32xf32, #tpu.memory_space<vmem>>, vector<4x32xf32>
    %cst_34 = arith.constant dense<0.000000e+00> : vector<4x32xf32>
    %62 = tpu.matmul %57, %7, %cst_34 {dimension_numbers = #tpu.dot_dimension_numbers<[1], [0], [0], [1], [0, 0, 1, 1], [], []>} : vector<4x32xf32>, vector<32x32xf32>, vector<4x32xf32> -> vector<4x32xf32>
    %63 = arith.addf %61, %62 : vector<4x32xf32>
    %64 = math.tanh %63 : vector<4x32xf32>
    %c8_i32 = arith.constant 8 : i32
    %c0_35 = arith.constant 0 : index
    %c0_36 = arith.constant 0 : index
    %65 = vector.load %arg4[%c0_35, %c0_36] : memref<32x8xf32, #tpu.memory_space<vmem>>, vector<32x8xf32>
    %cst_37 = arith.constant dense<0.000000e+00> : vector<4x8xf32>
    %66 = tpu.matmul %64, %65, %cst_37 {dimension_numbers = #tpu.dot_dimension_numbers<[1], [0], [0], [1], [0, 0, 1, 1], [], []>} : vector<4x32xf32>, vector<32x8xf32>, vector<4x8xf32> -> vector<4x8xf32>
    %c0_38 = arith.constant 0 : index
    %c0_39 = arith.constant 0 : index
    %67 = vector.load %arg5[%c0_38, %c0_39] : memref<1x8xf32, #tpu.memory_space<vmem>>, vector<1x8xf32>
    %68 = vector.broadcast %67 : vector<1x8xf32> to vector<4x8xf32>
    %69 = arith.addf %66, %68 : vector<4x8xf32>
    %c0_40 = arith.constant 0 : index
    %c0_41 = arith.constant 0 : index
    %70 = vector.load %arg7[%c0_40, %c0_41] : memref<4x8xf32, #tpu.memory_space<vmem>>, vector<4x8xf32>
    tpu.vector_store %arg7[%c0_40, %c0_41], %69 {strides = array<i32>} : memref<4x8xf32, #tpu.memory_space<vmem>>, vector<4x8xf32>,
    return
  }
}

</mosaic_0001>

<bundles_post_ra>
// kernel: tpu_custom_call.1
= control target key start
LH: loop header
LB: loop body
LE: loop exit
PB: predicated region body
PF: predicated region fallthrough
CT: control target
= control target key end

     0   :  { %vm40_vm0 = vcmask 130048   ;;  %v1140_v4 = vmov 0.0|0.0   ;;  %vm1141_vm1 = vmmov 0   ;;  %v1142_v10 = vmov 0.0   ;;  %s1320_s0 = inlined_call_operand.vmem [shape: f32[32,16], index: 0, kind: input, shape index: {}]   ;;  %s1321_s1 = inlined_call_operand.vmem [shape: f32[16,32], index: 1, kind: input, shape index: {}]   ;;  %s1322_s2 = inlined_call_operand.vmem [shape: f32[32,32], index: 2, kind: input, shape index: {}]   ;;  %s1323_s3 = inlined_call_operand.vmem [shape: f32[1,32], index: 3, kind: input, shape index: {}]   ;;  %s1324_s4 = inlined_call_operand.vmem [shape: f32[32,8], index: 4, kind: input, shape index: {}]   ;;  %s1325_s5 = inlined_call_operand.vmem [shape: f32[1,8], index: 5, kind: input, shape index: {}]   ;;  %s1326_s6 = inlined_call_operand.vmem [shape: f32[4,32], index: 6, kind: input, shape index: {}]   ;;  %s1327_s7 = inlined_call_operand.hbm [shape: f32[4,8], index: 7, kind: output, shape index: {}]  }
   0x1   :  { %v31_v0 = vld [vmem:[%s1321_s1] sm:$0xff]  ;;  %v32_v1 = vld [vmem:[%s1321_s1 + $0x8] sm:$0xff]  ;;  %1042 = vmatprep.subr.bf16.mxu1 %v1140_v4  ;;  %v145_v8 = vld [vmem:[%s1322_s2 + $0x10] sm:$0xff]  ;;  %947 = vmatprep.mubr.msk.f32.mxu1 %vm1141_vm1, %v1142_v10 }
   0x2   :  { %v27_v2 = vld [vmem:[%s1320_s0] sm:$0xff]  ;;  %v1038_v3 = vpack.c.bf16 %v32_v1, %v31_v0  ;;  %v144_v6 = vld [vmem:[%s1322_s2 + $0x8] sm:$0xff]  ;;  %v146_v9 = vld [vmem:[%s1322_s2 + $0x18] sm:$0xff] }
   0x3   :  { %933 = vmatprep.mubr.msk.f32.mxu0 %vm40_vm0, %v27_v2  ;;  %v143_v5 = vld [vmem:[%s1322_s2] sm:$0xff] }
   0x4   :  { %v1201_v7 = vpack.c.bf16 %v144_v6, %v143_v5  ;;  %1039 = vmatprep.subr.bf16.mxu0 %v1038_v3 }
   0x5   :  { %12 = vsyncpa [#allocation4], 0  ;;  %1041 = vmatpush3.bf16.msra.mxu0 %v1038_v3  ;;  %v28_v11 = vld [vmem:[%s1320_s0 + $0x8] sm:$0xff]  ;;  %v1215_v12 = vpack.c.bf16 %v146_v9, %v145_v8  ;;  %vm138_vm2 = vcmask 261120   ;;  %v147_v13 = vld [vmem:[%s1326_s6] sm:$0xf] }
   0x6   :  { %1044 = vmatpush3.bf16.msra.mxu1 %v1201_v7  ;;  %1048 = vmatprep.subr.bf16.mxu0 %v1140_v4  ;;  %v29_v14 = vld [vmem:[%s1320_s0 + $0x10] sm:$0xff]  ;;  %v30_v15 = vld [vmem:[%s1320_s0 + $0x18] sm:$0xff]  ;;  %v863_v16 = vld [vmem:[%s1323_s3] ss:$0 sm:$0xff]  ;;  %s1143_s30 = smov [#allocation3]   ;;  %vm847_vm3 = vcmask 60416  }
   0x7   :  { %1045 = vmatprep.subr.bf16.mxu1 %v1140_v4  ;;  %v763_v60 = vld [vmem:[%s1324_s4] sm:$0xff]  ;;  %v764_v61 = vld [vmem:[%s1324_s4 + $0x8] sm:$0xff]  ;;  %v765_v62 = vld [vmem:[%s1324_s4 + $0x10] sm:$0xff]  ;;  %s855_s8 = sshll.u32 %s1143_s30, 4  ;;  %s856_s8 = int_to_ptr.vmem [resolvable:$true] %s855_s8 }
   0x8   :  { %934 = vmatmul.mubr.msk.f32.vlgmr.msra.gmra.mrb[0].mxu0 %vm40_vm0, %v28_v11  ;;  %v1091_v63 = vpack.c.bf16 %v764_v61, %v763_v60  ;;  %v766_v0 = vld [vmem:[%s1324_s4 + $0x18] sm:$0xff]  ;;  %v876_v8 = vld [vmem:[%s1325_s5] ss:$0 sm:$0xff]  ;;  %s1116_s4 = scalar_lea.vmem %s856_s8, 64  ;;  %p1121_p1 = scmp.lt.s32.totalorder %s856_s8, %s856_s8 }
   0x9   :  { %1050 = vmatpush3.bf16.msra.mxu0 %v1201_v7  ;;  %936 = vmatprep.mubr.msk.f32.mxu0 %vm40_vm0, %v29_v14  ;;  %v1094_v1 = vpack.c.bf16 %v766_v0, %v765_v62  ;;  %p1117_p0 = scmp.ne.s32.totalorder %s856_s8, %s1116_s4  ;;  %p1122_p2 = scmp.lt.s32.totalorder %s1116_s4, %s1116_s4 }
   0xa   :  { %1047 = vmatpush3.bf16.msra.mxu1 %v1215_v12  ;;  %1051 = vmatprep.subr.bf16.mxu0 %v1140_v4 }
   0xb   :  { %1054 = vmatprep.subr.bf16.mxu1 %v1140_v4  ;;  %p1123_p3 = por %p1122_p2, %p1121_p1 }
   0xc   :  { %937 = vmatmul.mubr.msk.f32.gmra.mrb[2].mxu0 %vm40_vm0, %v30_v15 }
   0xd   :  { %948 = vmatmul.mubr.msk.f32.vlgmr.msra.gmra.mrb[0].mxu1 %vm138_vm2, %v147_v13  ;;  %1053 = vmatpush3.bf16.msra.mxu0 %v1215_v12  ;;  %p1124_p4 = pnand %p1123_p3, %p1117_p0 }
   0xe   :  { %1056 = vmatpush3.bf16.msra.mxu1 %v1201_v7  ;;  %969 = vmatprep.mubr.msk.f32.mxu1 %vm1141_vm1, %v1142_v10 }
   0xf   :  { %1057 = vmatprep.subr.bf16.mxu1 %v1140_v4  ;;  %1060 = vmatprep.subr.bf16.mxu0 %v1140_v4 }
  0x10   :  { %958 = vmatprep.mubr.msk.f32.mxu0 %vm1141_vm1, %v1142_v10 }
  0x12   :  { %1059 = vmatpush3.bf16.msra.mxu1 %v1215_v12 }
  0x13   :  { %1066 = vmatprep.subr.bf16.mxu1 %v1140_v4 }
  0xdb   :  { %v935_v17 = vpop.f32.mrb[0].mxu0 }
  0xdc   :  { %v125_v18 = vadd.f32 %v935_v17, %v863_v16  ;;  %v119_v19 = vpop.f32.mrb[1].mxu0 }
  0xdd   :  { %v120_v20 = vadd.f32 %v863_v16, %v119_v19 }
  0xde   :  { %140 = vst.msk [vmem:[#allocation2 + $0x8] sm:$0xff] %vm138_vm2, %v125_v18 }
  0xdf   :  { %139 = vst.msk [vmem:[#allocation2] sm:$0xff] %vm138_vm2, %v120_v20  ;;  %v938_v26 = vpop.f32.mrb[2].mxu0 }
  0xe0   :  { %v218_v21 = vpop.f32.mrb[0].mxu1  ;;  %v135_v27 = vadd.f32 %v938_v26, %v863_v16  ;;  %v129_v28 = vpop.f32.mrb[3].mxu0 }
  0xe1   :  { %v949_v22 = vpop.f32.mrb[1].mxu1  ;;  %v130_v29 = vadd.f32 %v863_v16, %v129_v28 }
  0xe2   :  { %142 = vst.msk [vmem:[#allocation2 + $0x18] sm:$0xff] %vm138_vm2, %v135_v27 }
  0xe3   :  { %141 = vst.msk [vmem:[#allocation2 + $0x10] sm:$0xff] %vm138_vm2, %v130_v29 }
  0xe5   :  { %v302_v35 = vld [vmem:[#allocation2 + $0x8] sm:$0xf]  ;;  %v379_v40 = vld [vmem:[#allocation2 + $0xc] sm:$0xf] }
  0xe6   :  { %v148_v23 = vld [vmem:[#allocation2] sm:$0xf]  ;;  %v225_v30 = vld [vmem:[#allocation2 + $0x4] sm:$0xf] }
  0xe7   :  { %v222_v24 = vadd.f32 %v218_v21, %v148_v23 }
  0xe9   :  { %1100 = vtanh.f32 %v222_v24  ;;  %v610_v55 = vld [vmem:[#allocation2 + $0x18] sm:$0xf]  ;;  %v687_v2 = vld [vmem:[#allocation2 + $0x1c] sm:$0xf] }
  0xea   :  { %v456_v45 = vld [vmem:[#allocation2 + $0x10] sm:$0xf]  ;;  %v533_v50 = vld [vmem:[#allocation2 + $0x14] sm:$0xf] }
  0xf3   :  { %v1101_v25 = vpop.eup %1100 }
  0xf4   :  { %959 = vmatmul.mubr.msk.f32.vlgmr.msra.gmra.mrb[4].mxu0 %vm138_vm2, %v1101_v25 }
  0xf5   :  { %1062 = vmatpush3.bf16.msra.mxu0 %v1201_v7  ;;  %980 = vmatprep.mubr.msk.f32.mxu0 %vm1141_vm1, %v1142_v10 }
  0xf6   :  { %1063 = vmatprep.subr.bf16.mxu0 %v1140_v4 }
  0xf9   :  { %1065 = vmatpush3.bf16.msra.mxu0 %v1215_v12 }
  0xfa   :  { %1072 = vmatprep.subr.bf16.mxu0 %v1140_v4 }
 0x1c7   :  { %v295_v31 = vpop.f32.mrb[4].mxu0 }
 0x1c8   :  { %v299_v32 = vadd.f32 %v295_v31, %v225_v30  ;;  %v960_v33 = vpop.f32.mrb[5].mxu0 }
 0x1ca   :  { %1102 = vtanh.f32 %v299_v32 }
 0x1d4   :  { %v1103_v34 = vpop.eup %1102 }
 0x1d5   :  { %970 = vmatmul.mubr.msk.f32.vlgmr.msra.gmra.mrb[2].mxu1 %vm138_vm2, %v1103_v34 }
 0x1d6   :  { %1068 = vmatpush3.bf16.msra.mxu1 %v1201_v7  ;;  %991 = vmatprep.mubr.msk.f32.mxu1 %vm1141_vm1, %v1142_v10 }
 0x1d7   :  { %1069 = vmatprep.subr.bf16.mxu1 %v1140_v4 }
 0x1da   :  { %1071 = vmatpush3.bf16.msra.mxu1 %v1215_v12 }
 0x1db   :  { %1078 = vmatprep.subr.bf16.mxu1 %v1140_v4 }
 0x2a8   :  { %v372_v36 = vpop.f32.mrb[2].mxu1 }
 0x2a9   :  { %v376_v37 = vadd.f32 %v372_v36, %v302_v35  ;;  %v971_v38 = vpop.f32.mrb[3].mxu1 }
 0x2ab   :  { %1104 = vtanh.f32 %v376_v37 }
 0x2b5   :  { %v1105_v39 = vpop.eup %1104 }
 0x2b6   :  { %981 = vmatmul.mubr.msk.f32.vlgmr.msra.gmra.mrb[6].mxu0 %vm138_vm2, %v1105_v39 }
 0x2b7   :  { %1074 = vmatpush3.bf16.msra.mxu0 %v1201_v7  ;;  %1002 = vmatprep.mubr.msk.f32.mxu0 %vm1141_vm1, %v1142_v10 }
 0x2b8   :  { %1075 = vmatprep.subr.bf16.mxu0 %v1140_v4 }
 0x2bb   :  { %1077 = vmatpush3.bf16.msra.mxu0 %v1215_v12 }
 0x2bc   :  { %1084 = vmatprep.subr.bf16.mxu0 %v1140_v4 }
 0x389   :  { %v449_v41 = vpop.f32.mrb[6].mxu0 }
 0x38a   :  { %v453_v42 = vadd.f32 %v449_v41, %v379_v40  ;;  %v982_v43 = vpop.f32.mrb[7].mxu0 }
 0x38c   :  { %1106 = vtanh.f32 %v453_v42 }
 0x396   :  { %v1107_v44 = vpop.eup %1106 }
 0x397   :  { %992 = vmatmul.mubr.msk.f32.vlgmr.msra.gmra.mrb[4].mxu1 %vm138_vm2, %v1107_v44 }
 0x398   :  { %1080 = vmatpush3.bf16.msra.mxu1 %v1201_v7  ;;  %1013 = vmatprep.mubr.msk.f32.mxu1 %vm1141_vm1, %v1142_v10 }
 0x399   :  { %1081 = vmatprep.subr.bf16.mxu1 %v1140_v4 }
 0x39c   :  { %1083 = vmatpush3.bf16.msra.mxu1 %v1215_v12 }
 0x39d   :  { %1090 = vmatprep.subr.bf16.mxu1 %v1140_v4 }
 0x46a   :  { %v526_v46 = vpop.f32.mrb[4].mxu1 }
 0x46b   :  { %v530_v47 = vadd.f32 %v526_v46, %v456_v45  ;;  %v993_v48 = vpop.f32.mrb[5].mxu1 }
 0x46d   :  { %1108 = vtanh.f32 %v530_v47 }
 0x477   :  { %v1109_v49 = vpop.eup %1108 }
 0x478   :  { %1003 = vmatmul.mubr.msk.f32.vlgmr.msra.gmra.mrb[8].mxu0 %vm138_vm2, %v1109_v49 }
 0x479   :  { %1086 = vmatpush3.bf16.msra.mxu0 %v1201_v7  ;;  %1024 = vmatprep.mubr.msk.f32.mxu0 %vm1141_vm1, %v1142_v10 }
 0x47a   :  { %1087 = vmatprep.subr.bf16.mxu0 %v1140_v4 }
 0x47d   :  { %1089 = vmatpush3.bf16.msra.mxu0 %v1215_v12 }
 0x54b   :  { %v603_v51 = vpop.f32.mrb[8].mxu0 }
 0x54c   :  { %v607_v52 = vadd.f32 %v603_v51, %v533_v50  ;;  %v1004_v53 = vpop.f32.mrb[9].mxu0 }
 0x54e   :  { %1110 = vtanh.f32 %v607_v52 }
 0x558   :  { %v1111_v54 = vpop.eup %1110 }
 0x559   :  { %1014 = vmatmul.mubr.msk.f32.vlgmr.msra.gmra.mrb[6].mxu1 %vm138_vm2, %v1111_v54 }
 0x55a   :  { %1035 = vmatprep.mubr.msk.f32.mxu1 %vm1141_vm1, %v1142_v10  ;;  %1092 = vmatpush3.bf16.msra.mxu1 %v1091_v63 }
 0x55b   :  { %1093 = vmatprep.subr.bf16.mxu1 %v1140_v4 }
 0x55e   :  { %1095 = vmatpush3.bf16.msra.mxu1 %v1094_v1 }
 0x62c   :  { %v680_v56 = vpop.f32.mrb[6].mxu1 }
 0x62d   :  { %v684_v57 = vadd.f32 %v680_v56, %v610_v55  ;;  %v1015_v58 = vpop.f32.mrb[7].mxu1 }
 0x62f   :  { %1112 = vtanh.f32 %v684_v57 }
 0x639   :  { %v1113_v59 = vpop.eup %1112 }
 0x63a   :  { %1025 = vmatmul.mubr.msk.f32.vlgmr.msra.gmra.mrb[10].mxu0 %vm138_vm2, %v1113_v59 }
 0x70d   :  { %v757_v3 = vpop.f32.mrb[10].mxu0 }
 0x70e   :  { %v761_v5 = vadd.f32 %v757_v3, %v687_v2  ;;  %v1026_v6 = vpop.f32.mrb[11].mxu0 }
 0x710   :  { %1114 = vtanh.f32 %v761_v5 }
 0x71a   :  { %v1115_v7 = vpop.eup %1114 }
 0x71b   :  { %1036 = vmatmul.mubr.msk.f32.vlgmr.msra.gmra.mrb[8].mxu1 %vm138_vm2, %v1115_v7 }
 0x7ee   :  { %v843_v9 = vpop.f32.mrb[8].mxu1 }
 0x7ef   :  { %v844_v10 = vadd.f32 %v876_v8, %v843_v9  ;;  %v1037_v11 = vpop.f32.mrb[9].mxu1 }
 0x7f1   :  { %848 = vst.msk [vmem:[#allocation3] sm:$0xf] %vm847_vm3, %v844_v10 }
 0x7f2   :  { %1127 = shalt.err (!%p1124_p4)
}
 0x7f3   :  { %s1128_s1 = scalar_lea.hbm %s1327_s7, 64 }
 0x7f4   :  { %p1129_p5 = scmp.ne.s32.totalorder %s1327_s7, %s1128_s1  ;;  %p1132_p6 = scmp.lt.u32.totalorder %s1128_s1, %s1327_s7 }
 0x7f6   :  { %p1134_p7 = pnand %p1132_p6, %p1129_p5 }
 0x7f8   :  { %1137 = shalt.err (!%p1134_p7)
}
 0x7f9   :  { %858 = dma.vmem_to_hbm [thread:$0]  %s856_s8, 64, %s1327_s7, [#allocation4]  }
 0x7fa   :  { %1138 = dma.done.wait [#allocation4], 64  }
 0x7fb   :  { %1139 = vsyncadd [#allocation4], 4294967232 }
 0x7fc   :  { %862 = vsyncpa [#allocation4], 1 }

</bundles_post_ra>
